<compile_context>
chip_gen: v5e
topology: v5e:2x2
jax: 0.10.0
libtpu: 0.0.40
codegen_flags: <defaults>
</compile_context>

<pallas_src>
import jax
import jax.numpy as jnp
from jax.experimental import pallas as pl
from jax.experimental.pallas import tpu as pltpu

EMBEDDING_WIDTH = 4
MAX_WORDS = 8          # vocab size AND sequence length in the reference harness
LSTM_HIDDEN = 8
IMG_FEATS = 784
IMG_FEATS_PAD = 896    # 7 * 128 — lane-aligned contraction dim for the image matmul
MLP_HIDDEN = 25
NUM_CLASSES = 10


def _sigmoid(x):
    # Single-EUP form (tanh) instead of exp + add + divide.
    return 0.5 * (jnp.tanh(0.5 * x) + 1.0)


def multimodal_kernel(ids_ref,     # (B, T)      int32  SMEM  token ids
                      xtab_ref,    # (V, 1, 4H)  f32    VMEM  emb @ W_ih^T + b_ih + b_hh
                      whh_t_ref,   # (H, 4H)     f32    LSTM hidden->gates (pre-transposed)
                      img_ref,     # (B, 896)    bf16   flattened image, zero-padded K
                      w1h_t_ref,   # (H, 25)     f32    linear_layer weight (h part, transposed)
                      w1i_t_ref,   # (896, 25)   bf16   linear_layer weight (image part, transposed, padded)
                      b1_ref,      # (1, 25)     f32
                      w2_t_ref,    # (25, 10)    f32    output_layer weight (transposed)
                      b2_ref,      # (1, 10)     f32
                      out_ref):    # (B, 10)     f32
    B, T = ids_ref.shape
    H = whh_t_ref.shape[0]

    whh_t = whh_t_ref[...]                      # hoisted once

    h = jnp.zeros((B, H), jnp.float32)
    c = jnp.zeros((B, H), jnp.float32)

    # LSTM recurrence (batch_first semantics; PyTorch gate order i, f, g, o).
    # T is small and static -> unrolled Python loop; only h @ W_hh remains per step.
    for t in range(T):
        # In-kernel embedding gather: scalar token id from SMEM indexes the leading
        # (untiled) dim of the folded gate-input table.
        xg_t = jnp.concatenate(
            [xtab_ref[ids_ref[b, t]] for b in range(B)], axis=0)       # (B, 4H)
        gates = xg_t + jnp.dot(h, whh_t, preferred_element_type=jnp.float32)
        sig = _sigmoid(gates)                   # whole-block activation (1 EUP push)
        th = jnp.tanh(gates)                    # whole-block activation (1 EUP push)
        i_g = sig[:, 0:H]
        f_g = sig[:, H:2 * H]
        g_g = th[:, 2 * H:3 * H]
        o_g = sig[:, 3 * H:4 * H]
        c = f_g * c + i_g * g_g
        h = o_g * jnp.tanh(c)

    # linear_layer over concat([h_n, image_flat]) split into two matmuls, then ReLU.
    z1 = (jnp.dot(h, w1h_t_ref[...], preferred_element_type=jnp.float32)
          + jnp.dot(img_ref[...], w1i_t_ref[...], preferred_element_type=jnp.float32)
          + b1_ref[...])
    z1 = jnp.maximum(z1, 0.0)

    # output_layer
    out_ref[...] = (jnp.dot(z1, w2_t_ref[...], preferred_element_type=jnp.float32)
                    + b2_ref[...])


def init_params(key):
    ks = jax.random.split(key, 9)
    h_scale = 1.0 / jnp.sqrt(jnp.float32(LSTM_HIDDEN))
    params = {
        # nn.Embedding(MAX_WORDS, EMBEDDING_WIDTH), init uniform(-0.05, 0.05)
        "emb": jax.random.uniform(ks[0], (MAX_WORDS, EMBEDDING_WIDTH),
                                  jnp.float32, -0.05, 0.05),
        # nn.LSTM(EMBEDDING_WIDTH, 8): weight_ih (4H, E), weight_hh (4H, H), biases (4H,)
        "w_ih": jax.random.uniform(ks[1], (4 * LSTM_HIDDEN, EMBEDDING_WIDTH),
                                   jnp.float32, -h_scale, h_scale),
        "w_hh": jax.random.uniform(ks[2], (4 * LSTM_HIDDEN, LSTM_HIDDEN),
                                   jnp.float32, -h_scale, h_scale),
        "b_ih": jax.random.uniform(ks[3], (4 * LSTM_HIDDEN,),
                                   jnp.float32, -h_scale, h_scale),
        "b_hh": jax.random.uniform(ks[4], (4 * LSTM_HIDDEN,),
                                   jnp.float32, -h_scale, h_scale),
        # nn.Linear(784 + 8, 25)
        "w1": jax.random.uniform(ks[5], (MLP_HIDDEN, IMG_FEATS + LSTM_HIDDEN),
                                 jnp.float32, -0.03, 0.03),
        "b1": jax.random.uniform(ks[6], (MLP_HIDDEN,), jnp.float32, -0.03, 0.03),
        # nn.Linear(25, 10)
        "w2": jax.random.uniform(ks[7], (NUM_CLASSES, MLP_HIDDEN),
                                 jnp.float32, -0.2, 0.2),
        "b2": jax.random.uniform(ks[8], (NUM_CLASSES,), jnp.float32, -0.2, 0.2),
    }
    return params


def _multimodal_forward(image, text, p):
    B = image.shape[0]
    H = LSTM_HIDDEN

    # ---- glue / precompute (tiny, fused by jit) --------------------------------------
    text = text.astype(jnp.int32)

    # Fold embedding + LSTM input projection + biases into a (V, 1, 4H) gather table.
    # The leading dim is the gather axis (untiled), so in-kernel dynamic indexing is cheap.
    # TODO(synk): folding emb @ W_ih^T is a param-only precompute; at V=8 it is cheaper
    # than any in-kernel one-hot matmul.
    xtab = (p["emb"] @ p["w_ih"].T + (p["b_ih"] + p["b_hh"]))
    xtab = xtab.reshape(MAX_WORDS, 1, 4 * LSTM_HIDDEN).astype(jnp.float32)

    # Image: flatten NCHW -> (B, 784), zero-pad K to 896 (7*128), cast to bf16 for the MXU.
    img_flat = image.reshape(B, IMG_FEATS).astype(jnp.float32)
    img_bf16 = jnp.pad(img_flat, ((0, 0), (0, IMG_FEATS_PAD - IMG_FEATS))
                       ).astype(jnp.bfloat16)                          # (B, 896)

    whh_t = p["w_hh"].T                                                # (H, 4H)
    w1h_t = p["w1"][:, :H].T                                           # (H, 25)  (h first in concat)
    w1i_t = jnp.pad(p["w1"][:, H:].T,
                    ((0, IMG_FEATS_PAD - IMG_FEATS), (0, 0))
                    ).astype(jnp.bfloat16)                             # (896, 25)
    b1 = p["b1"].reshape(1, MLP_HIDDEN)
    w2_t = p["w2"].T                                                   # (25, 10)
    b2 = p["b2"].reshape(1, NUM_CLASSES)

    vmem = pl.BlockSpec(memory_space=pltpu.MemorySpace.VMEM)
    smem = pl.BlockSpec(memory_space=pltpu.MemorySpace.SMEM)
    out = pl.pallas_call(
        multimodal_kernel,
        out_shape=jax.ShapeDtypeStruct((B, NUM_CLASSES), jnp.float32),
        in_specs=[smem] + [vmem] * 8,
        out_specs=vmem,
    )(text, xtab, whh_t, img_bf16, w1h_t, w1i_t, b1, w2_t, b2)
    return out


multimodal_forward = jax.jit(_multimodal_forward)


def reference_forward(image, text, p):
    """Plain-JAX reference mirroring the PyTorch forward (all f32)."""
    B = image.shape[0]
    T = text.shape[1]
    H = LSTM_HIDDEN
    x0 = p["emb"][text]                                           # (B, T, E)
    h = jnp.zeros((B, H), jnp.float32)
    c = jnp.zeros((B, H), jnp.float32)
    b = p["b_ih"] + p["b_hh"]
    for t in range(T):
        gates = x0[:, t, :] @ p["w_ih"].T + h @ p["w_hh"].T + b
        i_g = jax.nn.sigmoid(gates[:, 0:H])
        f_g = jax.nn.sigmoid(gates[:, H:2 * H])
        g_g = jnp.tanh(gates[:, 2 * H:3 * H])
        o_g = jax.nn.sigmoid(gates[:, 3 * H:4 * H])
        c = f_g * c + i_g * g_g
        h = o_g * jnp.tanh(c)
    x1 = image.reshape(B, IMG_FEATS)
    x = jnp.concatenate([h, x1], axis=1)
    x = jnp.maximum(x @ p["w1"].T + p["b1"], 0.0)
    return x @ p["w2"].T + p["b2"]


if __name__ == "__main__":
    key = jax.random.PRNGKey(0)
    k_img, k_txt, k_par = jax.random.split(key, 3)

    B = 2
    image = jax.random.normal(k_img, (B, 1, 28, 28), jnp.float32)     # NCHW
    text = jax.random.randint(k_txt, (B, MAX_WORDS), 0, MAX_WORDS, jnp.int32)
    params = init_params(k_par)

    out = multimodal_forward(image, text, params)
    out = jax.block_until_ready(out)

    ref = reference_forward(image, text, params)
    assert out.shape == (B, NUM_CLASSES)
    assert jnp.allclose(out, ref, atol=2e-2, rtol=2e-2), "mismatch vs reference"

    print("KERNEL_OK")
</pallas_src>

<mosaic_0001>
module attributes {stable_mosaic.version = 11 : i64} {
  func.func @multimodal_kernel(%arg0: memref<2x8xi32, #tpu.memory_space<smem>>, %arg1: memref<8x1x32xf32, #tpu.memory_space<vmem>>, %arg2: memref<8x32xf32, #tpu.memory_space<vmem>>, %arg3: memref<2x896xbf16, #tpu.memory_space<vmem>>, %arg4: memref<8x25xf32, #tpu.memory_space<vmem>>, %arg5: memref<896x25xbf16, #tpu.memory_space<vmem>>, %arg6: memref<1x25xf32, #tpu.memory_space<vmem>>, %arg7: memref<25x10xf32, #tpu.memory_space<vmem>>, %arg8: memref<1x10xf32, #tpu.memory_space<vmem>>, %arg9: memref<2x10xf32, #tpu.memory_space<vmem>>) attributes {dimension_semantics = [], scalar_prefetch = 0 : i64, scratch_operands = 0 : i64, tpu.core_type = #tpu.core_type<tc>} {
    %c0 = arith.constant 0 : index
    %c0_0 = arith.constant 0 : index
    %0 = vector.load %arg2[%c0, %c0_0] : memref<8x32xf32, #tpu.memory_space<vmem>>, vector<8x32xf32>
    %cst = arith.constant 0.000000e+00 : f32
    %1 = vector.broadcast %cst : f32 to vector<2x8xf32>
    %cst_1 = arith.constant 0.000000e+00 : f32
    %2 = vector.broadcast %cst_1 : f32 to vector<2x8xf32>
    %c0_2 = arith.constant 0 : index
    %c0_3 = arith.constant 0 : index
    %3 = memref.load %arg0[%c0_2, %c0_3] : memref<2x8xi32, #tpu.memory_space<smem>>
    %4 = arith.index_cast %3 : i32 to index
    %c0_4 = arith.constant 0 : index
    %c0_5 = arith.constant 0 : index
    %5 = vector.load %arg1[%4, %c0_4, %c0_5] : memref<8x1x32xf32, #tpu.memory_space<vmem>>, vector<1x1x32xf32>
    %6 = vector.shape_cast %5 : vector<1x1x32xf32> to vector<1x32xf32>
    %c1 = arith.constant 1 : index
    %c0_6 = arith.constant 0 : index
    %7 = memref.load %arg0[%c1, %c0_6] : memref<2x8xi32, #tpu.memory_space<smem>>
    %8 = arith.index_cast %7 : i32 to index
    %c0_7 = arith.constant 0 : index
    %c0_8 = arith.constant 0 : index
    %9 = vector.load %arg1[%8, %c0_7, %c0_8] : memref<8x1x32xf32, #tpu.memory_space<vmem>>, vector<1x1x32xf32>
    %10 = vector.shape_cast %9 : vector<1x1x32xf32> to vector<1x32xf32>
    %11 = tpu.concatenate %6, %10 in 0 : vector<1x32xf32>, vector<1x32xf32> -> vector<2x32xf32>
    %cst_9 = arith.constant dense<0.000000e+00> : vector<2x32xf32>
    %12 = tpu.matmul %1, %0, %cst_9 {dimension_numbers = #tpu.dot_dimension_numbers<[1], [0], [0], [1], [0, 0, 1, 1], [], []>} : vector<2x8xf32>, vector<8x32xf32>, vector<2x32xf32> -> vector<2x32xf32>
    %13 = arith.addf %11, %12 : vector<2x32xf32>
    %cst_10 = arith.constant 5.000000e-01 : f32
    %14 = vector.broadcast %cst_10 : f32 to vector<2x32xf32>
    %15 = arith.mulf %14, %13 : vector<2x32xf32>
    %16 = math.tanh %15 : vector<2x32xf32>
    %cst_11 = arith.constant 1.000000e+00 : f32
    %17 = vector.broadcast %cst_11 : f32 to vector<2x32xf32>
    %18 = arith.addf %16, %17 : vector<2x32xf32>
    %cst_12 = arith.constant 5.000000e-01 : f32
    %19 = vector.broadcast %cst_12 : f32 to vector<2x32xf32>
    %20 = arith.mulf %19, %18 : vector<2x32xf32>
    %21 = math.tanh %13 : vector<2x32xf32>
    %22 = vector.extract_strided_slice %20 {offsets = [0, 0], sizes = [2, 8], strides = [1, 1]} : vector<2x32xf32> to vector<2x8xf32>
    %23 = vector.extract_strided_slice %20 {offsets = [0, 8], sizes = [2, 8], strides = [1, 1]} : vector<2x32xf32> to vector<2x8xf32>
    %24 = vector.extract_strided_slice %21 {offsets = [0, 16], sizes = [2, 8], strides = [1, 1]} : vector<2x32xf32> to vector<2x8xf32>
    %25 = vector.extract_strided_slice %20 {offsets = [0, 24], sizes = [2, 8], strides = [1, 1]} : vector<2x32xf32> to vector<2x8xf32>
    %26 = arith.mulf %23, %2 : vector<2x8xf32>
    %27 = arith.mulf %22, %24 : vector<2x8xf32>
    %28 = arith.addf %26, %27 : vector<2x8xf32>
    %29 = math.tanh %28 : vector<2x8xf32>
    %30 = arith.mulf %25, %29 : vector<2x8xf32>
    %c0_13 = arith.constant 0 : index
    %c1_14 = arith.constant 1 : index
    %31 = memref.load %arg0[%c0_13, %c1_14] : memref<2x8xi32, #tpu.memory_space<smem>>
    %32 = arith.index_cast %31 : i32 to index
    %c0_15 = arith.constant 0 : index
    %c0_16 = arith.constant 0 : index
    %33 = vector.load %arg1[%32, %c0_15, %c0_16] : memref<8x1x32xf32, #tpu.memory_space<vmem>>, vector<1x1x32xf32>
    %34 = vector.shape_cast %33 : vector<1x1x32xf32> to vector<1x32xf32>
    %c1_17 = arith.constant 1 : index
    %c1_18 = arith.constant 1 : index
    %35 = memref.load %arg0[%c1_17, %c1_18] : memref<2x8xi32, #tpu.memory_space<smem>>
    %36 = arith.index_cast %35 : i32 to index
    %c0_19 = arith.constant 0 : index
    %c0_20 = arith.constant 0 : index
    %37 = vector.load %arg1[%36, %c0_19, %c0_20] : memref<8x1x32xf32, #tpu.memory_space<vmem>>, vector<1x1x32xf32>
    %38 = vector.shape_cast %37 : vector<1x1x32xf32> to vector<1x32xf32>
    %39 = tpu.concatenate %34, %38 in 0 : vector<1x32xf32>, vector<1x32xf32> -> vector<2x32xf32>
    %cst_21 = arith.constant dense<0.000000e+00> : vector<2x32xf32>
    %40 = tpu.matmul %30, %0, %cst_21 {dimension_numbers = #tpu.dot_dimension_numbers<[1], [0], [0], [1], [0, 0, 1, 1], [], []>} : vector<2x8xf32>, vector<8x32xf32>, vector<2x32xf32> -> vector<2x32xf32>
    %41 = arith.addf %39, %40 : vector<2x32xf32>
    %cst_22 = arith.constant 5.000000e-01 : f32
    %42 = vector.broadcast %cst_22 : f32 to vector<2x32xf32>
    %43 = arith.mulf %42, %41 : vector<2x32xf32>
    %44 = math.tanh %43 : vector<2x32xf32>
    %cst_23 = arith.constant 1.000000e+00 : f32
    %45 = vector.broadcast %cst_23 : f32 to vector<2x32xf32>
    %46 = arith.addf %44, %45 : vector<2x32xf32>
    %cst_24 = arith.constant 5.000000e-01 : f32
    %47 = vector.broadcast %cst_24 : f32 to vector<2x32xf32>
    %48 = arith.mulf %47, %46 : vector<2x32xf32>
    %49 = math.tanh %41 : vector<2x32xf32>
    %50 = vector.extract_strided_slice %48 {offsets = [0, 0], sizes = [2, 8], strides = [1, 1]} : vector<2x32xf32> to vector<2x8xf32>
    %51 = vector.extract_strided_slice %48 {offsets = [0, 8], sizes = [2, 8], strides = [1, 1]} : vector<2x32xf32> to vector<2x8xf32>
    %52 = vector.extract_strided_slice %49 {offsets = [0, 16], sizes = [2, 8], strides = [1, 1]} : vector<2x32xf32> to vector<2x8xf32>
    %53 = vector.extract_strided_slice %48 {offsets = [0, 24], sizes = [2, 8], strides = [1, 1]} : vector<2x32xf32> to vector<2x8xf32>
    %54 = arith.mulf %51, %28 : vector<2x8xf32>
    %55 = arith.mulf %50, %52 : vector<2x8xf32>
    %56 = arith.addf %54, %55 : vector<2x8xf32>
    %57 = math.tanh %56 : vector<2x8xf32>
    %58 = arith.mulf %53, %57 : vector<2x8xf32>
    %c0_25 = arith.constant 0 : index
    %c2 = arith.constant 2 : index
    %59 = memref.load %arg0[%c0_25, %c2] : memref<2x8xi32, #tpu.memory_space<smem>>
    %60 = arith.index_cast %59 : i32 to index
    %c0_26 = arith.constant 0 : index
    %c0_27 = arith.constant 0 : index
    %61 = vector.load %arg1[%60, %c0_26, %c0_27] : memref<8x1x32xf32, #tpu.memory_space<vmem>>, vector<1x1x32xf32>
    %62 = vector.shape_cast %61 : vector<1x1x32xf32> to vector<1x32xf32>
    %c1_28 = arith.constant 1 : index
    %c2_29 = arith.constant 2 : index
    %63 = memref.load %arg0[%c1_28, %c2_29] : memref<2x8xi32, #tpu.memory_space<smem>>
    %64 = arith.index_cast %63 : i32 to index
    %c0_30 = arith.constant 0 : index
    %c0_31 = arith.constant 0 : index
    %65 = vector.load %arg1[%64, %c0_30, %c0_31] : memref<8x1x32xf32, #tpu.memory_space<vmem>>, vector<1x1x32xf32>
    %66 = vector.shape_cast %65 : vector<1x1x32xf32> to vector<1x32xf32>
    %67 = tpu.concatenate %62, %66 in 0 : vector<1x32xf32>, vector<1x32xf32> -> vector<2x32xf32>
    %cst_32 = arith.constant dense<0.000000e+00> : vector<2x32xf32>
    %68 = tpu.matmul %58, %0, %cst_32 {dimension_numbers = #tpu.dot_dimension_numbers<[1], [0], [0], [1], [0, 0, 1, 1], [], []>} : vector<2x8xf32>, vector<8x32xf32>, vector<2x32xf32> -> vector<2x32xf32>
    %69 = arith.addf %67, %68 : vector<2x32xf32>
    %cst_33 = arith.constant 5.000000e-01 : f32
    %70 = vector.broadcast %cst_33 : f32 to vector<2x32xf32>
    %71 = arith.mulf %70, %69 : vector<2x32xf32>
    %72 = math.tanh %71 : vector<2x32xf32>
    %cst_34 = arith.constant 1.000000e+00 : f32
    %73 = vector.broadcast %cst_34 : f32 to vector<2x32xf32>
    %74 = arith.addf %72, %73 : vector<2x32xf32>
    %cst_35 = arith.constant 5.000000e-01 : f32
    %75 = vector.broadcast %cst_35 : f32 to vector<2x32xf32>
    %76 = arith.mulf %75, %74 : vector<2x32xf32>
    %77 = math.tanh %69 : vector<2x32xf32>
    %78 = vector.extract_strided_slice %76 {offsets = [0, 0], sizes = [2, 8], strides = [1, 1]} : vector<2x32xf32> to vector<2x8xf32>
    %79 = vector.extract_strided_slice %76 {offsets = [0, 8], sizes = [2, 8], strides = [1, 1]} : vector<2x32xf32> to vector<2x8xf32>
    %80 = vector.extract_strided_slice %77 {offsets = [0, 16], sizes = [2, 8], strides = [1, 1]} : vector<2x32xf32> to vector<2x8xf32>
    %81 = vector.extract_strided_slice %76 {offsets = [0, 24], sizes = [2, 8], strides = [1, 1]} : vector<2x32xf32> to vector<2x8xf32>
    %82 = arith.mulf %79, %56 : vector<2x8xf32>
    %83 = arith.mulf %78, %80 : vector<2x8xf32>
    %84 = arith.addf %82, %83 : vector<2x8xf32>
    %85 = math.tanh %84 : vector<2x8xf32>
    %86 = arith.mulf %81, %85 : vector<2x8xf32>
    %c0_36 = arith.constant 0 : index
    %c3 = arith.constant 3 : index
    %87 = memref.load %arg0[%c0_36, %c3] : memref<2x8xi32, #tpu.memory_space<smem>>
    %88 = arith.index_cast %87 : i32 to index
    %c0_37 = arith.constant 0 : index
    %c0_38 = arith.constant 0 : index
    %89 = vector.load %arg1[%88, %c0_37, %c0_38] : memref<8x1x32xf32, #tpu.memory_space<vmem>>, vector<1x1x32xf32>
    %90 = vector.shape_cast %89 : vector<1x1x32xf32> to vector<1x32xf32>
    %c1_39 = arith.constant 1 : index
    %c3_40 = arith.constant 3 : index
    %91 = memref.load %arg0[%c1_39, %c3_40] : memref<2x8xi32, #tpu.memory_space<smem>>
    %92 = arith.index_cast %91 : i32 to index
    %c0_41 = arith.constant 0 : index
    %c0_42 = arith.constant 0 : index
    %93 = vector.load %arg1[%92, %c0_41, %c0_42] : memref<8x1x32xf32, #tpu.memory_space<vmem>>, vector<1x1x32xf32>
    %94 = vector.shape_cast %93 : vector<1x1x32xf32> to vector<1x32xf32>
    %95 = tpu.concatenate %90, %94 in 0 : vector<1x32xf32>, vector<1x32xf32> -> vector<2x32xf32>
    %cst_43 = arith.constant dense<0.000000e+00> : vector<2x32xf32>
    %96 = tpu.matmul %86, %0, %cst_43 {dimension_numbers = #tpu.dot_dimension_numbers<[1], [0], [0], [1], [0, 0, 1, 1], [], []>} : vector<2x8xf32>, vector<8x32xf32>, vector<2x32xf32> -> vector<2x32xf32>
    %97 = arith.addf %95, %96 : vector<2x32xf32>
    %cst_44 = arith.constant 5.000000e-01 : f32
    %98 = vector.broadcast %cst_44 : f32 to vector<2x32xf32>
    %99 = arith.mulf %98, %97 : vector<2x32xf32>
    %100 = math.tanh %99 : vector<2x32xf32>
    %cst_45 = arith.constant 1.000000e+00 : f32
    %101 = vector.broadcast %cst_45 : f32 to vector<2x32xf32>
    %102 = arith.addf %100, %101 : vector<2x32xf32>
    %cst_46 = arith.constant 5.000000e-01 : f32
    %103 = vector.broadcast %cst_46 : f32 to vector<2x32xf32>
    %104 = arith.mulf %103, %102 : vector<2x32xf32>
    %105 = math.tanh %97 : vector<2x32xf32>
    %106 = vector.extract_strided_slice %104 {offsets = [0, 0], sizes = [2, 8], strides = [1, 1]} : vector<2x32xf32> to vector<2x8xf32>
    %107 = vector.extract_strided_slice %104 {offsets = [0, 8], sizes = [2, 8], strides = [1, 1]} : vector<2x32xf32> to vector<2x8xf32>
    %108 = vector.extract_strided_slice %105 {offsets = [0, 16], sizes = [2, 8], strides = [1, 1]} : vector<2x32xf32> to vector<2x8xf32>
    %109 = vector.extract_strided_slice %104 {offsets = [0, 24], sizes = [2, 8], strides = [1, 1]} : vector<2x32xf32> to vector<2x8xf32>
    %110 = arith.mulf %107, %84 : vector<2x8xf32>
    %111 = arith.mulf %106, %108 : vector<2x8xf32>
    %112 = arith.addf %110, %111 : vector<2x8xf32>
    %113 = math.tanh %112 : vector<2x8xf32>
    %114 = arith.mulf %109, %113 : vector<2x8xf32>
    %c0_47 = arith.constant 0 : index
    %c4 = arith.constant 4 : index
    %115 = memref.load %arg0[%c0_47, %c4] : memref<2x8xi32, #tpu.memory_space<smem>>
    %116 = arith.index_cast %115 : i32 to index
    %c0_48 = arith.constant 0 : index
    %c0_49 = arith.constant 0 : index
    %117 = vector.load %arg1[%116, %c0_48, %c0_49] : memref<8x1x32xf32, #tpu.memory_space<vmem>>, vector<1x1x32xf32>
    %118 = vector.shape_cast %117 : vector<1x1x32xf32> to vector<1x32xf32>
    %c1_50 = arith.constant 1 : index
    %c4_51 = arith.constant 4 : index
    %119 = memref.load %arg0[%c1_50, %c4_51] : memref<2x8xi32, #tpu.memory_space<smem>>
    %120 = arith.index_cast %119 : i32 to index
    %c0_52 = arith.constant 0 : index
    %c0_53 = arith.constant 0 : index
    %121 = vector.load %arg1[%120, %c0_52, %c0_53] : memref<8x1x32xf32, #tpu.memory_space<vmem>>, vector<1x1x32xf32>
    %122 = vector.shape_cast %121 : vector<1x1x32xf32> to vector<1x32xf32>
    %123 = tpu.concatenate %118, %122 in 0 : vector<1x32xf32>, vector<1x32xf32> -> vector<2x32xf32>
    %cst_54 = arith.constant dense<0.000000e+00> : vector<2x32xf32>
    %124 = tpu.matmul %114, %0, %cst_54 {dimension_numbers = #tpu.dot_dimension_numbers<[1], [0], [0], [1], [0, 0, 1, 1], [], []>} : vector<2x8xf32>, vector<8x32xf32>, vector<2x32xf32> -> vector<2x32xf32>
    %125 = arith.addf %123, %124 : vector<2x32xf32>
    %cst_55 = arith.constant 5.000000e-01 : f32
    %126 = vector.broadcast %cst_55 : f32 to vector<2x32xf32>
    %127 = arith.mulf %126, %125 : vector<2x32xf32>
    %128 = math.tanh %127 : vector<2x32xf32>
    %cst_56 = arith.constant 1.000000e+00 : f32
    %129 = vector.broadcast %cst_56 : f32 to vector<2x32xf32>
    %130 = arith.addf %128, %129 : vector<2x32xf32>
    %cst_57 = arith.constant 5.000000e-01 : f32
    %131 = vector.broadcast %cst_57 : f32 to vector<2x32xf32>
    %132 = arith.mulf %131, %130 : vector<2x32xf32>
    %133 = math.tanh %125 : vector<2x32xf32>
    %134 = vector.extract_strided_slice %132 {offsets = [0, 0], sizes = [2, 8], strides = [1, 1]} : vector<2x32xf32> to vector<2x8xf32>
    %135 = vector.extract_strided_slice %132 {offsets = [0, 8], sizes = [2, 8], strides = [1, 1]} : vector<2x32xf32> to vector<2x8xf32>
    %136 = vector.extract_strided_slice %133 {offsets = [0, 16], sizes = [2, 8], strides = [1, 1]} : vector<2x32xf32> to vector<2x8xf32>
    %137 = vector.extract_strided_slice %132 {offsets = [0, 24], sizes = [2, 8], strides = [1, 1]} : vector<2x32xf32> to vector<2x8xf32>
    %138 = arith.mulf %135, %112 : vector<2x8xf32>
    %139 = arith.mulf %134, %136 : vector<2x8xf32>
    %140 = arith.addf %138, %139 : vector<2x8xf32>
    %141 = math.tanh %140 : vector<2x8xf32>
    %142 = arith.mulf %137, %141 : vector<2x8xf32>
    %c0_58 = arith.constant 0 : index
    %c5 = arith.constant 5 : index
    %143 = memref.load %arg0[%c0_58, %c5] : memref<2x8xi32, #tpu.memory_space<smem>>
    %144 = arith.index_cast %143 : i32 to index
    %c0_59 = arith.constant 0 : index
    %c0_60 = arith.constant 0 : index
    %145 = vector.load %arg1[%144, %c0_59, %c0_60] : memref<8x1x32xf32, #tpu.memory_space<vmem>>, vector<1x1x32xf32>
    %146 = vector.shape_cast %145 : vector<1x1x32xf32> to vector<1x32xf32>
    %c1_61 = arith.constant 1 : index
    %c5_62 = arith.constant 5 : index
    %147 = memref.load %arg0[%c1_61, %c5_62] : memref<2x8xi32, #tpu.memory_space<smem>>
    %148 = arith.index_cast %147 : i32 to index
    %c0_63 = arith.constant 0 : index
    %c0_64 = arith.constant 0 : index
    %149 = vector.load %arg1[%148, %c0_63, %c0_64] : memref<8x1x32xf32, #tpu.memory_space<vmem>>, vector<1x1x32xf32>
    %150 = vector.shape_cast %149 : vector<1x1x32xf32> to vector<1x32xf32>
    %151 = tpu.concatenate %146, %150 in 0 : vector<1x32xf32>, vector<1x32xf32> -> vector<2x32xf32>
    %cst_65 = arith.constant dense<0.000000e+00> : vector<2x32xf32>
    %152 = tpu.matmul %142, %0, %cst_65 {dimension_numbers = #tpu.dot_dimension_numbers<[1], [0], [0], [1], [0, 0, 1, 1], [], []>} : vector<2x8xf32>, vector<8x32xf32>, vector<2x32xf32> -> vector<2x32xf32>
    %153 = arith.addf %151, %152 : vector<2x32xf32>
    %cst_66 = arith.constant 5.000000e-01 : f32
    %154 = vector.broadcast %cst_66 : f32 to vector<2x32xf32>
    %155 = arith.mulf %154, %153 : vector<2x32xf32>
    %156 = math.tanh %155 : vector<2x32xf32>
    %cst_67 = arith.constant 1.000000e+00 : f32
    %157 = vector.broadcast %cst_67 : f32 to vector<2x32xf32>
    %158 = arith.addf %156, %157 : vector<2x32xf32>
    %cst_68 = arith.constant 5.000000e-01 : f32
    %159 = vector.broadcast %cst_68 : f32 to vector<2x32xf32>
    %160 = arith.mulf %159, %158 : vector<2x32xf32>
    %161 = math.tanh %153 : vector<2x32xf32>
    %162 = vector.extract_strided_slice %160 {offsets = [0, 0], sizes = [2, 8], strides = [1, 1]} : vector<2x32xf32> to vector<2x8xf32>
    %163 = vector.extract_strided_slice %160 {offsets = [0, 8], sizes = [2, 8], strides = [1, 1]} : vector<2x32xf32> to vector<2x8xf32>
    %164 = vector.extract_strided_slice %161 {offsets = [0, 16], sizes = [2, 8], strides = [1, 1]} : vector<2x32xf32> to vector<2x8xf32>
    %165 = vector.extract_strided_slice %160 {offsets = [0, 24], sizes = [2, 8], strides = [1, 1]} : vector<2x32xf32> to vector<2x8xf32>
    %166 = arith.mulf %163, %140 : vector<2x8xf32>
    %167 = arith.mulf %162, %164 : vector<2x8xf32>
    %168 = arith.addf %166, %167 : vector<2x8xf32>
    %169 = math.tanh %168 : vector<2x8xf32>
    %170 = arith.mulf %165, %169 : vector<2x8xf32>
    %c0_69 = arith.constant 0 : index
    %c6 = arith.constant 6 : index
    %171 = memref.load %arg0[%c0_69, %c6] : memref<2x8xi32, #tpu.memory_space<smem>>
    %172 = arith.index_cast %171 : i32 to index
    %c0_70 = arith.constant 0 : index
    %c0_71 = arith.constant 0 : index
    %173 = vector.load %arg1[%172, %c0_70, %c0_71] : memref<8x1x32xf32, #tpu.memory_space<vmem>>, vector<1x1x32xf32>
    %174 = vector.shape_cast %173 : vector<1x1x32xf32> to vector<1x32xf32>
    %c1_72 = arith.constant 1 : index
    %c6_73 = arith.constant 6 : index
    %175 = memref.load %arg0[%c1_72, %c6_73] : memref<2x8xi32, #tpu.memory_space<smem>>
    %176 = arith.index_cast %175 : i32 to index
    %c0_74 = arith.constant 0 : index
    %c0_75 = arith.constant 0 : index
    %177 = vector.load %arg1[%176, %c0_74, %c0_75] : memref<8x1x32xf32, #tpu.memory_space<vmem>>, vector<1x1x32xf32>
    %178 = vector.shape_cast %177 : vector<1x1x32xf32> to vector<1x32xf32>
    %179 = tpu.concatenate %174, %178 in 0 : vector<1x32xf32>, vector<1x32xf32> -> vector<2x32xf32>
    %cst_76 = arith.constant dense<0.000000e+00> : vector<2x32xf32>
    %180 = tpu.matmul %170, %0, %cst_76 {dimension_numbers = #tpu.dot_dimension_numbers<[1], [0], [0], [1], [0, 0, 1, 1], [], []>} : vector<2x8xf32>, vector<8x32xf32>, vector<2x32xf32> -> vector<2x32xf32>
    %181 = arith.addf %179, %180 : vector<2x32xf32>
    %cst_77 = arith.constant 5.000000e-01 : f32
    %182 = vector.broadcast %cst_77 : f32 to vector<2x32xf32>
    %183 = arith.mulf %182, %181 : vector<2x32xf32>
    %184 = math.tanh %183 : vector<2x32xf32>
    %cst_78 = arith.constant 1.000000e+00 : f32
    %185 = vector.broadcast %cst_78 : f32 to vector<2x32xf32>
    %186 = arith.addf %184, %185 : vector<2x32xf32>
    %cst_79 = arith.constant 5.000000e-01 : f32
    %187 = vector.broadcast %cst_79 : f32 to vector<2x32xf32>
    %188 = arith.mulf %187, %186 : vector<2x32xf32>
    %189 = math.tanh %181 : vector<2x32xf32>
    %190 = vector.extract_strided_slice %188 {offsets = [0, 0], sizes = [2, 8], strides = [1, 1]} : vector<2x32xf32> to vector<2x8xf32>
    %191 = vector.extract_strided_slice %188 {offsets = [0, 8], sizes = [2, 8], strides = [1, 1]} : vector<2x32xf32> to vector<2x8xf32>
    %192 = vector.extract_strided_slice %189 {offsets = [0, 16], sizes = [2, 8], strides = [1, 1]} : vector<2x32xf32> to vector<2x8xf32>
    %193 = vector.extract_strided_slice %188 {offsets = [0, 24], sizes = [2, 8], strides = [1, 1]} : vector<2x32xf32> to vector<2x8xf32>
    %194 = arith.mulf %191, %168 : vector<2x8xf32>
    %195 = arith.mulf %190, %192 : vector<2x8xf32>
    %196 = arith.addf %194, %195 : vector<2x8xf32>
    %197 = math.tanh %196 : vector<2x8xf32>
    %198 = arith.mulf %193, %197 : vector<2x8xf32>
    %c0_80 = arith.constant 0 : index
    %c7 = arith.constant 7 : index
    %199 = memref.load %arg0[%c0_80, %c7] : memref<2x8xi32, #tpu.memory_space<smem>>
    %200 = arith.index_cast %199 : i32 to index
    %c0_81 = arith.constant 0 : index
    %c0_82 = arith.constant 0 : index
    %201 = vector.load %arg1[%200, %c0_81, %c0_82] : memref<8x1x32xf32, #tpu.memory_space<vmem>>, vector<1x1x32xf32>
    %202 = vector.shape_cast %201 : vector<1x1x32xf32> to vector<1x32xf32>
    %c1_83 = arith.constant 1 : index
    %c7_84 = arith.constant 7 : index
    %203 = memref.load %arg0[%c1_83, %c7_84] : memref<2x8xi32, #tpu.memory_space<smem>>
    %204 = arith.index_cast %203 : i32 to index
    %c0_85 = arith.constant 0 : index
    %c0_86 = arith.constant 0 : index
    %205 = vector.load %arg1[%204, %c0_85, %c0_86] : memref<8x1x32xf32, #tpu.memory_space<vmem>>, vector<1x1x32xf32>
    %206 = vector.shape_cast %205 : vector<1x1x32xf32> to vector<1x32xf32>
    %207 = tpu.concatenate %202, %206 in 0 : vector<1x32xf32>, vector<1x32xf32> -> vector<2x32xf32>
    %cst_87 = arith.constant dense<0.000000e+00> : vector<2x32xf32>
    %208 = tpu.matmul %198, %0, %cst_87 {dimension_numbers = #tpu.dot_dimension_numbers<[1], [0], [0], [1], [0, 0, 1, 1], [], []>} : vector<2x8xf32>, vector<8x32xf32>, vector<2x32xf32> -> vector<2x32xf32>
    %209 = arith.addf %207, %208 : vector<2x32xf32>
    %cst_88 = arith.constant 5.000000e-01 : f32
    %210 = vector.broadcast %cst_88 : f32 to vector<2x32xf32>
    %211 = arith.mulf %210, %209 : vector<2x32xf32>
    %212 = math.tanh %211 : vector<2x32xf32>
    %cst_89 = arith.constant 1.000000e+00 : f32
    %213 = vector.broadcast %cst_89 : f32 to vector<2x32xf32>
    %214 = arith.addf %212, %213 : vector<2x32xf32>
    %cst_90 = arith.constant 5.000000e-01 : f32
    %215 = vector.broadcast %cst_90 : f32 to vector<2x32xf32>
    %216 = arith.mulf %215, %214 : vector<2x32xf32>
    %217 = math.tanh %209 : vector<2x32xf32>
    %218 = vector.extract_strided_slice %216 {offsets = [0, 0], sizes = [2, 8], strides = [1, 1]} : vector<2x32xf32> to vector<2x8xf32>
    %219 = vector.extract_strided_slice %216 {offsets = [0, 8], sizes = [2, 8], strides = [1, 1]} : vector<2x32xf32> to vector<2x8xf32>
    %220 = vector.extract_strided_slice %217 {offsets = [0, 16], sizes = [2, 8], strides = [1, 1]} : vector<2x32xf32> to vector<2x8xf32>
    %221 = vector.extract_strided_slice %216 {offsets = [0, 24], sizes = [2, 8], strides = [1, 1]} : vector<2x32xf32> to vector<2x8xf32>
    %222 = arith.mulf %219, %196 : vector<2x8xf32>
    %223 = arith.mulf %218, %220 : vector<2x8xf32>
    %224 = arith.addf %222, %223 : vector<2x8xf32>
    %225 = math.tanh %224 : vector<2x8xf32>
    %226 = arith.mulf %221, %225 : vector<2x8xf32>
    %c0_91 = arith.constant 0 : index
    %c0_92 = arith.constant 0 : index
    %227 = vector.load %arg4[%c0_91, %c0_92] : memref<8x25xf32, #tpu.memory_space<vmem>>, vector<8x25xf32>
    %cst_93 = arith.constant dense<0.000000e+00> : vector<2x25xf32>
    %228 = tpu.matmul %226, %227, %cst_93 {dimension_numbers = #tpu.dot_dimension_numbers<[1], [0], [0], [1], [0, 0, 1, 1], [], []>} : vector<2x8xf32>, vector<8x25xf32>, vector<2x25xf32> -> vector<2x25xf32>
    %c0_94 = arith.constant 0 : index
    %c0_95 = arith.constant 0 : index
    %229 = vector.load %arg3[%c0_94, %c0_95] : memref<2x896xbf16, #tpu.memory_space<vmem>>, vector<2x896xbf16>
    %c0_96 = arith.constant 0 : index
    %c0_97 = arith.constant 0 : index
    %230 = vector.load %arg5[%c0_96, %c0_97] : memref<896x25xbf16, #tpu.memory_space<vmem>>, vector<896x25xbf16>
    %cst_98 = arith.constant dense<0.000000e+00> : vector<2x25xf32>
    %231 = tpu.matmul %229, %230, %cst_98 {dimension_numbers = #tpu.dot_dimension_numbers<[1], [0], [0], [1], [0, 0, 1, 1], [], []>} : vector<2x896xbf16>, vector<896x25xbf16>, vector<2x25xf32> -> vector<2x25xf32>
    %232 = arith.addf %228, %231 : vector<2x25xf32>
    %c0_99 = arith.constant 0 : index
    %c0_100 = arith.constant 0 : index
    %233 = vector.load %arg6[%c0_99, %c0_100] : memref<1x25xf32, #tpu.memory_space<vmem>>, vector<1x25xf32>
    %234 = vector.broadcast %233 : vector<1x25xf32> to vector<2x25xf32>
    %235 = arith.addf %232, %234 : vector<2x25xf32>
    %cst_101 = arith.constant 0.000000e+00 : f32
    %236 = vector.broadcast %cst_101 : f32 to vector<2x25xf32>
    %237 = arith.maximumf %235, %236 : vector<2x25xf32>
    %c0_102 = arith.constant 0 : index
    %c0_103 = arith.constant 0 : index
    %238 = vector.load %arg7[%c0_102, %c0_103] : memref<25x10xf32, #tpu.memory_space<vmem>>, vector<25x10xf32>
    %cst_104 = arith.constant dense<0.000000e+00> : vector<2x10xf32>
    %239 = tpu.matmul %237, %238, %cst_104 {dimension_numbers = #tpu.dot_dimension_numbers<[1], [0], [0], [1], [0, 0, 1, 1], [], []>} : vector<2x25xf32>, vector<25x10xf32>, vector<2x10xf32> -> vector<2x10xf32>
    %c0_105 = arith.constant 0 : index
    %c0_106 = arith.constant 0 : index
    %240 = vector.load %arg8[%c0_105, %c0_106] : memref<1x10xf32, #tpu.memory_space<vmem>>, vector<1x10xf32>
    %241 = vector.broadcast %240 : vector<1x10xf32> to vector<2x10xf32>
    %242 = arith.addf %239, %241 : vector<2x10xf32>
    %c0_107 = arith.constant 0 : index
    %c0_108 = arith.constant 0 : index
    %243 = vector.load %arg9[%c0_107, %c0_108] : memref<2x10xf32, #tpu.memory_space<vmem>>, vector<2x10xf32>
    tpu.vector_store %arg9[%c0_107, %c0_108], %242 {strides = array<i32>} : memref<2x10xf32, #tpu.memory_space<vmem>>, vector<2x10xf32>,
    return
  }
}

</mosaic_0001>

<bundles_post_ra>
// kernel: _multimodal_forward.1
= control target key start
LH: loop header
LB: loop body
LE: loop exit
PB: predicated region body
PF: predicated region fallthrough
CT: control target
= control target key end

     0   :  { %14 = vsyncpa [#allocation4], 0  ;;  %s1939_s0 = inlined_call_operand.vmem [shape: s32[2,8], index: 0, kind: input, shape index: {}]   ;;  %s1940_s1 = inlined_call_operand.vmem [shape: f32[8,1,32], index: 1, kind: input, shape index: {}]   ;;  %s1941_s2 = inlined_call_operand.vmem [shape: f32[8,32], index: 2, kind: input, shape index: {}]   ;;  %s1942_s3 = inlined_call_operand.vmem [shape: bf16[2,896], index: 3, kind: input, shape index: {}]   ;;  %s1943_s4 = inlined_call_operand.vmem [shape: f32[8,25], index: 4, kind: input, shape index: {}]   ;;  %s1944_s5 = inlined_call_operand.vmem [shape: bf16[896,25], index: 5, kind: input, shape index: {}]   ;;  %s1945_s6 = inlined_call_operand.vmem [shape: f32[1,25], index: 6, kind: input, shape index: {}]   ;;  %s1946_s7 = inlined_call_operand.vmem [shape: f32[25,10], index: 7, kind: input, shape index: {}]   ;;  %s1947_s8 = inlined_call_operand.vmem [shape: f32[1,10], index: 8, kind: input, shape index: {}]   ;;  %s1948_s9 = inlined_call_operand.hbm [shape: f32[2,10], index: 9, kind: output, shape index: {}]  }
   0x1   :  { %15 = vsyncpa [#allocation3], 0  ;;  %s21_s11 = sshll.u32 %s1939_s0, 4  ;;  %s1579_s12 = smov [#allocation2]   ;;  %s22_s11 = int_to_ptr.vmem [resolvable:$true] %s21_s11 }
   0x2   :  { %24 = dma.vmem_to_smem %s22_s11, 32, %s1579_s12, [#allocation4]  }
   0x3   :  { %1575 = dma.done.wait [#allocation4], 32  }
   0x4   :  { %1576 = vsyncadd [#allocation4], 4294967264 }
   0x5   :  { %45 = sfence }
   0x6   :  { %v46_v0 = vld [vmem:[%s1941_s2] sm:$0xff]  ;;  %s1169_s15 = sld [smem:[#allocation2 + $0x80]]  ;;  %v1580_v1 = vmov 0.0   ;;  %vm56_vm0 = vcmask 1040384   ;;  %s1581_s21 = smov 112   ;;  %vm58_vm1 = vcmask 64512  }
   0x7   :  { %77 = vmatpush.msra.mxu3 %v46_v0  ;;  %135 = vmatpush.msra.mxu1 %v46_v0  ;;  %s47_s18 = sld [smem:[#allocation2]]  ;;  %s1582_s22 = smov 8   ;;  %vm1107_vm2 = vcmask 203776   ;;  %vm1134_vm3 = vcmask 74752  }
   0x8   :  { %78 = vmatmul.f32.vlgmr.msra.gmra.mxu3 %v1580_v1  ;;  %193 = vmatpush.msra.mxu2 %v46_v0  ;;  %s1583_s23 = smov 16   ;;  %s1171_s24 = sld [smem:[#allocation2 + $0x81]] }
   0x9   :  { %251 = vmatpush.msrb.mxu3 %v46_v0  ;;  %309 = vmatpush.msra.mxu0 %v46_v0  ;;  %s1584_s28 = smov 104   ;;  %s1170_s29 = sld [smem:[#allocation2 + $0x1]] }
   0xa   :  { %367 = vmatpush.msrb.mxu1 %v46_v0  ;;  %425 = vmatpush.msrb.mxu2 %v46_v0  ;;  %s1174_s12 = sld [smem:[#allocation2 + $0x82]] }
   0xb   :  { %483 = vmatpush.msra.mxu3 %v46_v0  ;;  %s1173_s0 = sld [smem:[#allocation2 + $0x2]] }
   0xc   :  { %s51_s17 = scalar_lea.vmem %s1940_s1, %s1169_s15  ;;  %s1177_s19 = sld [smem:[#allocation2 + $0x83]] }
   0xd   :  { %s48_s2 = scalar_lea.vmem %s1940_s1, %s47_s18  ;;  %v1481_v2 = vld [vmem:[%s51_s17] ss:$0 sm:$0xff]  ;;  %s1176_s25 = sld [smem:[#allocation2 + $0x3]] }
   0xe   :  { %v49_v3 = vld [vmem:[%s48_s2] sm:$0x1]  ;;  %s109_s27 = scalar_lea.vmem %s1940_s1, %s1171_s24  ;;  %s1180_s30 = sld [smem:[#allocation2 + $0x84]] }
   0xf   :  { %v57_v4 = vsel %vm56_vm0, %v49_v3, %v1481_v2  ;;  %s106_s11 = scalar_lea.vmem %s1940_s1, %s1170_s29  ;;  %v1482_v21 = vld [vmem:[%s109_s27] ss:$0 sm:$0xff]  ;;  %s1179_s13 = sld [smem:[#allocation2 + $0x4]] }
  0x10   :  { %v107_v22 = vld [vmem:[%s106_s11] sm:$0x1]  ;;  %s167_s15 = scalar_lea.vmem %s1940_s1, %s1174_s12  ;;  %s1183_s16 = sld [smem:[#allocation2 + $0x85]] }
  0x11   :  { %v114_v23 = vsel %vm56_vm0, %v107_v22, %v1482_v21  ;;  %s164_s18 = scalar_lea.vmem %s1940_s1, %s1173_s0  ;;  %v1483_v40 = vld [vmem:[%s167_s15] ss:$0 sm:$0xff]  ;;  %s1182_s20 = sld [smem:[#allocation2 + $0x5]] }
  0x12   :  { %v165_v41 = vld [vmem:[%s164_s18] sm:$0x1]  ;;  %s225_s24 = scalar_lea.vmem %s1940_s1, %s1177_s19  ;;  %s1186_s26 = sld [smem:[#allocation2 + $0x86]] }
  0x13   :  { %v172_v42 = vsel %vm56_vm0, %v165_v41, %v1483_v40  ;;  %s222_s29 = scalar_lea.vmem %s1940_s1, %s1176_s25  ;;  %v1484_v59 = vld [vmem:[%s225_s24] ss:$0 sm:$0xff]  ;;  %s1185_s10 = sld [smem:[#allocation2 + $0x6]] }
  0x14   :  { %v223_v60 = vld [vmem:[%s222_s29] sm:$0x1]  ;;  %s283_s12 = scalar_lea.vmem %s1940_s1, %s1180_s30  ;;  %s1189_s14 = sld [smem:[#allocation2 + $0x87]] }
  0x15   :  { %v230_v61 = vsel %vm56_vm0, %v223_v60, %v1484_v59  ;;  %s280_s0 = scalar_lea.vmem %s1940_s1, %s1179_s13  ;;  %s1188_s17 = sld [smem:[#allocation2 + $0x7]] }
  0x16   :  { %s341_s19 = scalar_lea.vmem %s1940_s1, %s1183_s16 }
  0x17   :  { %s338_s25 = scalar_lea.vmem %s1940_s1, %s1182_s20 }
  0x18   :  { %s399_s30 = scalar_lea.vmem %s1940_s1, %s1186_s26 }
  0x19   :  { %s396_s13 = scalar_lea.vmem %s1940_s1, %s1185_s10 }
  0x1a   :  { %s457_s16 = scalar_lea.vmem %s1940_s1, %s1189_s14 }
  0x1b   :  { %s454_s20 = scalar_lea.vmem %s1940_s1, %s1188_s17 }
  0x8b   :  { %v79_v5 = vpop.f32.mrf.mxu3 }
  0x8c   :  { %v82_v6 = vadd.f32 %v79_v5, %v57_v4 }
  0x8e   :  { %1491 = vtanh.f32 %v82_v6  ;;  %v83_v8 = vmul.f32 0.5, %v82_v6 }
  0x90   :  { %1493 = vtanh.f32 %v83_v8 }
  0x94   :  { %v1492_v7 = vpop.eup %1491 }
  0x95   :  { %90 = vrot.lane.b32.xlu0 %v1492_v7, %s1581_s21 }
  0x96   :  { %v1494_v9 = vpop.eup %1493 }
  0x97   :  { %v85_v10 = vadd.f32 1.0, %v1494_v9 }
  0x99   :  { %v86_v11 = vmul.f32 0.5, %v85_v10 }
  0x9b   :  { %v88_v14 = vmul.f32 0.0, %v86_v11 }
 0x107   :  { %v91_v12 = vpop.permute.xlu0 %90 }
 0x108   :  { %v93_v13 = vmul.f32 %v91_v12, %v86_v11 }
 0x10a   :  { %95 = vrot.lane.b32.xlu0 %v93_v13, %s1582_s22 }
 0x17c   :  { %v96_v15 = vpop.permute.xlu0 %95 }
 0x17d   :  { %v98_v16 = vadd.f32 %v96_v15, %v88_v14  ;;  %v1485_v14 = vld [vmem:[%s283_s12] ss:$0 sm:$0xff] }
 0x17e   :  { %v281_v15 = vld [vmem:[%s280_s0] sm:$0x1] }
 0x17f   :  { %1495 = vtanh.f32 %v98_v16 }
 0x185   :  { %v1496_v17 = vpop.eup %1495 }
 0x186   :  { %101 = vrot.lane.b32.xlu1 %v1496_v17, %s1583_s23 }
 0x1f8   :  { %v102_v18 = vpop.permute.xlu1 %101 }
 0x1f9   :  { %v104_v19 = vmul.f32 %v102_v18, %v86_v11 }
 0x1fb   :  { %116 = vrot.lane.b32.xlu1 %v104_v19, %s1584_s28 }
 0x26d   :  { %v117_v20 = vpop.permute.xlu1 %116 }
 0x26e   :  { %1172 = vmatmul.msk.f32.vlgmr.msra.gmra.mxu1 %vm58_vm1, %v117_v20 }
 0x2eb   :  { %v137_v24 = vpop.f32.mrf.mxu1 }
 0x2ec   :  { %v140_v25 = vadd.f32 %v137_v24, %v114_v23 }
 0x2ee   :  { %1497 = vtanh.f32 %v140_v25  ;;  %v141_v27 = vmul.f32 0.5, %v140_v25 }
 0x2f0   :  { %1499 = vtanh.f32 %v141_v27 }
 0x2f4   :  { %v1498_v26 = vpop.eup %1497 }
 0x2f5   :  { %148 = vrot.lane.b32.xlu2 %v1498_v26, %s1581_s21 }
 0x2f6   :  { %v1500_v28 = vpop.eup %1499 }
 0x2f7   :  { %v143_v29 = vadd.f32 1.0, %v1500_v28 }
 0x2f9   :  { %v144_v30 = vmul.f32 0.5, %v143_v29 }
 0x2fb   :  { %v146_v33 = vmul.f32 %v144_v30, %v98_v16  ;;  %v288_v16 = vsel %vm56_vm0, %v281_v15, %v1485_v14 }
 0x34f   :  { %v149_v31 = vpop.permute.xlu2 %148 }
 0x350   :  { %v151_v32 = vmul.f32 %v149_v31, %v144_v30 }
 0x352   :  { %153 = vrot.lane.b32.xlu2 %v151_v32, %s1582_s22 }
 0x3ac   :  { %v154_v34 = vpop.permute.xlu2 %153 }
 0x3ad   :  { %v156_v35 = vadd.f32 %v154_v34, %v146_v33  ;;  %v1486_v33 = vld [vmem:[%s341_s19] ss:$0 sm:$0xff] }
 0x3ae   :  { %v339_v34 = vld [vmem:[%s338_s25] sm:$0x1]  ;;  %s1585_s25 = smov [#allocation5]  }
 0x3af   :  { %1501 = vtanh.f32 %v156_v35  ;;  %s1141_s26 = sshll.u32 %s1585_s25, 4  ;;  %s1142_s26 = int_to_ptr.vmem [resolvable:$true] %s1141_s26 }
 0x3b5   :  { %v1502_v36 = vpop.eup %1501 }
 0x3b6   :  { %159 = vrot.lane.b32.xlu0 %v1502_v36, %s1583_s23 }
 0x428   :  { %v160_v37 = vpop.permute.xlu0 %159 }
 0x429   :  { %v162_v38 = vmul.f32 %v160_v37, %v144_v30 }
 0x42b   :  { %174 = vrot.lane.b32.xlu1 %v162_v38, %s1584_s28 }
 0x49d   :  { %v175_v39 = vpop.permute.xlu1 %174 }
 0x49e   :  { %1175 = vmatmul.msk.f32.vlgmr.msra.gmra.mxu2 %vm58_vm1, %v175_v39 }
 0x521   :  { %v195_v43 = vpop.f32.mrf.mxu2 }
 0x522   :  { %v198_v44 = vadd.f32 %v195_v43, %v172_v42 }
 0x524   :  { %1503 = vtanh.f32 %v198_v44  ;;  %v199_v46 = vmul.f32 0.5, %v198_v44 }
 0x526   :  { %1505 = vtanh.f32 %v199_v46 }
 0x52a   :  { %v1504_v45 = vpop.eup %1503 }
 0x52b   :  { %206 = vrot.lane.b32.xlu2 %v1504_v45, %s1581_s21 }
 0x52c   :  { %v1506_v47 = vpop.eup %1505 }
 0x52d   :  { %v201_v48 = vadd.f32 1.0, %v1506_v47 }
 0x52f   :  { %v202_v49 = vmul.f32 0.5, %v201_v48 }
 0x531   :  { %v204_v52 = vmul.f32 %v202_v49, %v156_v35  ;;  %v346_v35 = vsel %vm56_vm0, %v339_v34, %v1486_v33  ;;  %v1448_v33 = vld [vmem:[%s1944_s5 + $0xf0] sm:$0xff]  ;;  %v1438_v34 = vld [vmem:[%s1944_s5 + $0xa0] sm:$0xff] }
 0x585   :  { %v207_v50 = vpop.permute.xlu2 %206 }
 0x586   :  { %v209_v51 = vmul.f32 %v207_v50, %v202_v49 }
 0x588   :  { %211 = vrot.lane.b32.xlu0 %v209_v51, %s1582_s22 }
 0x5fa   :  { %v212_v53 = vpop.permute.xlu0 %211 }
 0x5fb   :  { %v214_v54 = vadd.f32 %v212_v53, %v204_v52  ;;  %v1487_v52 = vld [vmem:[%s399_s30] ss:$0 sm:$0xff] }
 0x5fc   :  { %v397_v53 = vld [vmem:[%s396_s13] sm:$0x1] }
 0x5fd   :  { %1507 = vtanh.f32 %v214_v54 }
 0x603   :  { %v1508_v55 = vpop.eup %1507 }
 0x604   :  { %217 = vrot.lane.b32.xlu1 %v1508_v55, %s1583_s23 }
 0x676   :  { %v218_v56 = vpop.permute.xlu1 %217 }
 0x677   :  { %v220_v57 = vmul.f32 %v218_v56, %v202_v49 }
 0x679   :  { %232 = vrot.lane.b32.xlu2 %v220_v57, %s1584_s28 }
 0x6d3   :  { %v233_v58 = vpop.permute.xlu2 %232 }
 0x6d4   :  { %1178 = vmatmul.msk.f32.vlgmr.msrb.gmra.mxu3 %vm58_vm1, %v233_v58 }
 0x757   :  { %v253_v62 = vpop.f32.mrf.mxu3 }
 0x758   :  { %v256_v63 = vadd.f32 %v253_v62, %v230_v61 }
 0x75a   :  { %1509 = vtanh.f32 %v256_v63  ;;  %v257_v1 = vmul.f32 0.5, %v256_v63 }
 0x75c   :  { %1511 = vtanh.f32 %v257_v1 }
 0x760   :  { %v1510_v0 = vpop.eup %1509 }
 0x761   :  { %264 = vrot.lane.b32.xlu0 %v1510_v0, %s1581_s21 }
 0x762   :  { %v1512_v2 = vpop.eup %1511 }
 0x763   :  { %v259_v3 = vadd.f32 1.0, %v1512_v2 }
 0x765   :  { %v260_v4 = vmul.f32 0.5, %v259_v3 }
 0x767   :  { %v262_v7 = vmul.f32 %v260_v4, %v214_v54  ;;  %v404_v54 = vsel %vm56_vm0, %v397_v53, %v1487_v52  ;;  %v1418_v52 = vld [vmem:[%s1944_s5] sm:$0xff]  ;;  %v1473_v53 = vld [vmem:[%s1944_s5 + $0x1b8] sm:$0xff] }
 0x7d3   :  { %v265_v5 = vpop.permute.xlu0 %264 }
 0x7d4   :  { %v267_v6 = vmul.f32 %v265_v5, %v260_v4 }
 0x7d6   :  { %269 = vrot.lane.b32.xlu1 %v267_v6, %s1582_s22 }
 0x848   :  { %v270_v8 = vpop.permute.xlu1 %269 }
 0x849   :  { %v272_v9 = vadd.f32 %v270_v8, %v262_v7  ;;  %v1488_v7 = vld [vmem:[%s457_s16] ss:$0 sm:$0xff] }
 0x84a   :  { %v455_v8 = vld [vmem:[%s454_s20] sm:$0x1] }
 0x84b   :  { %1513 = vtanh.f32 %v272_v9 }
 0x851   :  { %v1514_v10 = vpop.eup %1513 }
 0x852   :  { %275 = vrot.lane.b32.xlu2 %v1514_v10, %s1583_s23 }
 0x8ac   :  { %v276_v11 = vpop.permute.xlu2 %275 }
 0x8ad   :  { %v278_v12 = vmul.f32 %v276_v11, %v260_v4 }
 0x8af   :  { %290 = vrot.lane.b32.xlu0 %v278_v12, %s1584_s28 }
 0x921   :  { %v291_v13 = vpop.permute.xlu0 %290 }
 0x922   :  { %1181 = vmatmul.msk.f32.vlgmr.msra.gmra.mxu0 %vm58_vm1, %v291_v13 }
 0x99f   :  { %v311_v17 = vpop.f32.mrf.mxu0 }
 0x9a0   :  { %v314_v18 = vadd.f32 %v311_v17, %v288_v16 }
 0x9a2   :  { %1515 = vtanh.f32 %v314_v18  ;;  %v315_v20 = vmul.f32 0.5, %v314_v18 }
 0x9a4   :  { %1517 = vtanh.f32 %v315_v20 }
 0x9a8   :  { %v1516_v19 = vpop.eup %1515 }
 0x9a9   :  { %322 = vrot.lane.b32.xlu1 %v1516_v19, %s1581_s21 }
 0x9aa   :  { %v1518_v21 = vpop.eup %1517 }
 0x9ab   :  { %v317_v22 = vadd.f32 1.0, %v1518_v21 }
 0x9ad   :  { %v318_v23 = vmul.f32 0.5, %v317_v22 }
 0x9af   :  { %v320_v26 = vmul.f32 %v318_v23, %v272_v9  ;;  %v462_v9 = vsel %vm56_vm0, %v455_v8, %v1488_v7  ;;  %v1470_v8 = vld [vmem:[%s1944_s5 + $0x1a0] sm:$0xff] }
 0xa1b   :  { %v323_v24 = vpop.permute.xlu1 %322 }
 0xa1c   :  { %v325_v25 = vmul.f32 %v323_v24, %v318_v23  ;;  %v1425_v24 = vld [vmem:[%s1944_s5 + $0x38] sm:$0xff] }
 0xa1d   :  { %977 = vmatpush.bf16.msrb.mxu0 %v1425_v24 }
 0xa1e   :  { %327 = vrot.lane.b32.xlu2 %v325_v25, %s1582_s22  ;;  %v1433_v25 = vld [vmem:[%s1944_s5 + $0x78] sm:$0xff] }
 0xa1f   :  { %990 = vmatpush.bf16.msra.mxu1 %v1433_v25 }
 0xa78   :  { %v328_v27 = vpop.permute.xlu2 %327 }
 0xa79   :  { %v330_v28 = vadd.f32 %v328_v27, %v320_v26  ;;  %v1440_v26 = vld [vmem:[%s1944_s5 + $0xb0] sm:$0xff] }
 0xa7a   :  { %v1424_v27 = vld [vmem:[%s1944_s5 + $0x30] sm:$0xff] }
 0xa7b   :  { %1519 = vtanh.f32 %v330_v28  ;;  %978 = vmatpush.bf16.msrb.mxu0 %v1424_v27 }
 0xa81   :  { %v1520_v29 = vpop.eup %1519 }
 0xa82   :  { %333 = vrot.lane.b32.xlu0 %v1520_v29, %s1583_s23  ;;  %v1449_v29 = vld [vmem:[%s1944_s5 + $0xf8] sm:$0xff] }
 0xa83   :  { %1016 = vmatpush.bf16.msrb.mxu3 %v1449_v29 }
 0xa87   :  { %1017 = vmatpush.bf16.msrb.mxu3 %v1448_v33 }
 0xaf4   :  { %v334_v30 = vpop.permute.xlu0 %333 }
 0xaf5   :  { %v336_v31 = vmul.f32 %v334_v30, %v318_v23  ;;  %v1441_v23 = vld [vmem:[%s1944_s5 + $0xb8] sm:$0xff]  ;;  %v1439_v30 = vld [vmem:[%s1944_s5 + $0xa8] sm:$0xff] }
 0xaf6   :  { %1003 = vmatpush.bf16.msra.mxu2 %v1441_v23 }
 0xaf7   :  { %348 = vrot.lane.b32.xlu1 %v336_v31, %s1584_s28  ;;  %v1423_v31 = vld [vmem:[%s1944_s5 + $0x28] sm:$0xff] }
 0xaf8   :  { %979 = vmatpush.bf16.msrb.mxu0 %v1423_v31 }
 0xafa   :  { %1004 = vmatpush.bf16.msra.mxu2 %v1440_v26 }
 0xafe   :  { %1005 = vmatpush.bf16.msra.mxu2 %v1439_v30 }
 0xb02   :  { %1006 = vmatpush.bf16.msra.mxu2 %v1438_v34  ;;  %v1102_v34 = vld [vmem:[%s1946_s7 + $0x18] sm:$0x1] }
 0xb69   :  { %v349_v32 = vpop.permute.xlu1 %348 }
 0xb6a   :  { %1184 = vmatmul.msk.f32.vlgmr.msrb.gmra.mxu1 %vm58_vm1, %v349_v32  ;;  %v1431_v32 = vld [vmem:[%s1944_s5 + $0x68] sm:$0xff] }
 0xbe7   :  { %v369_v36 = vpop.f32.mrf.mxu1 }
 0xbe8   :  { %v372_v37 = vadd.f32 %v369_v36, %v346_v35  ;;  %v1422_v35 = vld [vmem:[%s1944_s5 + $0x20] sm:$0xff] }
 0xbe9   :  { %v1430_v36 = vld [vmem:[%s1944_s5 + $0x60] sm:$0xff]  ;;  %980 = vmatpush.bf16.msrb.mxu0 %v1422_v35 }
 0xbea   :  { %1521 = vtanh.f32 %v372_v37  ;;  %v373_v39 = vmul.f32 0.5, %v372_v37  ;;  %v1447_v37 = vld [vmem:[%s1944_s5 + $0xe8] sm:$0xff] }
 0xbeb   :  { %1018 = vmatpush.bf16.msrb.mxu3 %v1447_v37 }
 0xbec   :  { %1523 = vtanh.f32 %v373_v39  ;;  %v1421_v39 = vld [vmem:[%s1944_s5 + $0x18] sm:$0xff] }
 0xbed   :  { %981 = vmatpush.bf16.msrb.mxu0 %v1421_v39 }
 0xbf0   :  { %v1522_v38 = vpop.eup %1521 }
 0xbf1   :  { %380 = vrot.lane.b32.xlu2 %v1522_v38, %s1581_s21  ;;  %v1437_v38 = vld [vmem:[%s1944_s5 + $0x98] sm:$0xff] }
 0xbf2   :  { %v1524_v40 = vpop.eup %1523  ;;  %1007 = vmatpush.bf16.msra.mxu2 %v1437_v38 }
 0xbf3   :  { %v375_v41 = vadd.f32 1.0, %v1524_v40  ;;  %v512_v40 = vld [vmem:[%s1942_s3] sm:$0x7f] }
 0xbf4   :  { %626 = vst [vmem:[#allocation1] ss:$9 sm:$0xff] %v512_v40 }
 0xbf5   :  { %v376_v42 = vmul.f32 0.5, %v375_v41  ;;  %v1429_v41 = vld [vmem:[%s1944_s5 + $0x58] sm:$0xff] }
 0xbf7   :  { %v378_v45 = vmul.f32 %v376_v42, %v330_v28  ;;  %v1432_v28 = vld [vmem:[%s1944_s5 + $0x70] sm:$0xff] }
 0xbf8   :  { %991 = vmatpush.bf16.msra.mxu1 %v1432_v28 }
 0xbfb   :  { %v630_v7 = vld [vmem:[#allocation1 + $0x1b] sm:$0xff]  ;;  %v631_v24 = vld [vmem:[#allocation1 + $0x24] sm:$0xff]  ;;  %v632_v25 = vld [vmem:[#allocation1 + $0x2d] sm:$0xff] }
 0xbfc   :  { %992 = vmatpush.bf16.msra.mxu1 %v1431_v32  ;;  %v633_v23 = vld [vmem:[#allocation1 + $0x36] sm:$0xff] }
 0xc00   :  { %993 = vmatpush.bf16.msra.mxu1 %v1430_v36 }
 0xc04   :  { %994 = vmatpush.bf16.msra.mxu1 %v1429_v41 }
 0xc4b   :  { %v381_v43 = vpop.permute.xlu2 %380 }
 0xc4c   :  { %v383_v44 = vmul.f32 %v381_v43, %v376_v42  ;;  %v1436_v43 = vld [vmem:[%s1944_s5 + $0x90] sm:$0xff] }
 0xc4d   :  { %1008 = vmatpush.bf16.msra.mxu2 %v1436_v43 }
 0xc4e   :  { %385 = vrot.lane.b32.xlu0 %v383_v44, %s1582_s22  ;;  %v1420_v44 = vld [vmem:[%s1944_s5 + $0x10] sm:$0xff] }
 0xc4f   :  { %982 = vmatpush.bf16.msrb.mxu0 %v1420_v44 }
 0xcc0   :  { %v386_v46 = vpop.permute.xlu0 %385 }
 0xcc1   :  { %v388_v47 = vadd.f32 %v386_v46, %v378_v45  ;;  %v1428_v45 = vld [vmem:[%s1944_s5 + $0x50] sm:$0xff]  ;;  %v1445_v46 = vld [vmem:[%s1944_s5 + $0xd8] sm:$0xff] }
 0xcc2   :  { %995 = vmatpush.bf16.msra.mxu1 %v1428_v45 }
 0xcc3   :  { %1525 = vtanh.f32 %v388_v47 }
 0xcc9   :  { %v1526_v48 = vpop.eup %1525 }
 0xcca   :  { %391 = vrot.lane.b32.xlu1 %v1526_v48, %s1583_s23  ;;  %v1419_v48 = vld [vmem:[%s1944_s5 + $0x8] sm:$0xff] }
 0xccb   :  { %983 = vmatpush.bf16.msrb.mxu0 %v1419_v48  ;;  %v1101_v48 = vld [vmem:[%s1946_s7 + $0x10] sm:$0xff] }
 0xccf   :  { %984 = vmatpush.bf16.msrb.mxu0 %v1418_v52 }
 0xd3c   :  { %v392_v49 = vpop.permute.xlu1 %391 }
 0xd3d   :  { %v394_v50 = vmul.f32 %v392_v49, %v376_v42  ;;  %v1446_v42 = vld [vmem:[%s1944_s5 + $0xe0] sm:$0xff]  ;;  %v1427_v49 = vld [vmem:[%s1944_s5 + $0x48] sm:$0xff] }
 0xd3e   :  { %1019 = vmatpush.bf16.msrb.mxu3 %v1446_v42  ;;  %996 = vmatpush.bf16.msra.mxu1 %v1427_v49  ;;  %v1100_v49 = vld [vmem:[%s1946_s7 + $0x8] sm:$0xff] }
 0xd3f   :  { %406 = vrot.lane.b32.xlu2 %v394_v50, %s1584_s28  ;;  %v1444_v50 = vld [vmem:[%s1944_s5 + $0xd0] sm:$0xff] }
 0xd42   :  { %1020 = vmatpush.bf16.msrb.mxu3 %v1445_v46 }
 0xd46   :  { %1021 = vmatpush.bf16.msrb.mxu3 %v1444_v50  ;;  %v1099_v50 = vld [vmem:[%s1946_s7] sm:$0xff]  ;;  %s1143_s7 = sshll.u32 %s1948_s9, 4  ;;  %s1144_s7 = int_to_ptr.hbm [resolvable:$true] %s1143_s7 }
 0xd99   :  { %v407_v51 = vpop.permute.xlu2 %406 }
 0xd9a   :  { %1187 = vmatmul.msk.f32.vlgmr.msrb.gmra.mxu2 %vm58_vm1, %v407_v51  ;;  %v1434_v51 = vld [vmem:[%s1944_s5 + $0x80] sm:$0xff] }
 0xe1d   :  { %v427_v55 = vpop.f32.mrf.mxu2 }
 0xe1e   :  { %v430_v56 = vadd.f32 %v427_v55, %v404_v54  ;;  %v1457_v54 = vld [vmem:[%s1944_s5 + $0x138] sm:$0xff]  ;;  %v1426_v55 = vld [vmem:[%s1944_s5 + $0x40] sm:$0xff] }
 0xe1f   :  { %1029 = vmatpush.bf16.msra.mxu0 %v1457_v54  ;;  %997 = vmatpush.bf16.msra.mxu1 %v1426_v55 }
 0xe20   :  { %1527 = vtanh.f32 %v430_v56  ;;  %v431_v58 = vmul.f32 0.5, %v430_v56 }
 0xe22   :  { %1529 = vtanh.f32 %v431_v58  ;;  %v1443_v58 = vld [vmem:[%s1944_s5 + $0xc8] sm:$0xff] }
 0xe23   :  { %1022 = vmatpush.bf16.msrb.mxu3 %v1443_v58 }
 0xe26   :  { %v1528_v57 = vpop.eup %1527 }
 0xe27   :  { %438 = vrot.lane.b32.xlu0 %v1528_v57, %s1581_s21  ;;  %v1465_v57 = vld [vmem:[%s1944_s5 + $0x178] sm:$0xff] }
 0xe28   :  { %v1530_v59 = vpop.eup %1529  ;;  %1042 = vmatpush.bf16.msrb.mxu1 %v1465_v57 }
 0xe29   :  { %v433_v60 = vadd.f32 1.0, %v1530_v59 }
 0xe2b   :  { %v434_v61 = vmul.f32 0.5, %v433_v60  ;;  %v1472_v60 = vld [vmem:[%s1944_s5 + $0x1b0] sm:$0xff] }
 0xe2d   :  { %v436_v0 = vmul.f32 %v434_v61, %v388_v47  ;;  %v1435_v47 = vld [vmem:[%s1944_s5 + $0x88] sm:$0xff] }
 0xe2e   :  { %1009 = vmatpush.bf16.msra.mxu2 %v1435_v47 }
 0xe32   :  { %1010 = vmatpush.bf16.msra.mxu2 %v1434_v51  ;;  %v1489_v51 = vld [vmem:[%s1945_s6] ss:$0 sm:$0xff] }
 0xe36   :  { %1055 = vmatpush.bf16.msrb.mxu2 %v1473_v53 }
 0xe3a   :  { %1056 = vmatpush.bf16.msrb.mxu2 %v1472_v60 }
 0xe99   :  { %v439_v62 = vpop.permute.xlu0 %438 }
 0xe9a   :  { %v441_v63 = vmul.f32 %v439_v62, %v434_v61  ;;  %v629_v62 = vld [vmem:[#allocation1 + $0x12] sm:$0xff] }
 0xe9b   :  { %1011 = vmatmul.bf16.vlgmr.msra.gmra.mxu2 %v629_v62 }
 0xe9c   :  { %443 = vrot.lane.b32.xlu1 %v441_v63, %s1582_s22  ;;  %v627_v63 = vld [vmem:[#allocation1] sm:$0xff] }
 0xe9d   :  { %985 = vmatmul.bf16.vlgmr.msrb.gmra.mxu0 %v627_v63 }
 0xf0e   :  { %v444_v1 = vpop.permute.xlu1 %443 }
 0xf0f   :  { %v446_v2 = vadd.f32 %v444_v1, %v436_v0  ;;  %v1464_v0 = vld [vmem:[%s1944_s5 + $0x170] sm:$0xff]  ;;  %v1442_v1 = vld [vmem:[%s1944_s5 + $0xc0] sm:$0xff] }
 0xf10   :  { %1043 = vmatpush.bf16.msrb.mxu1 %v1464_v0  ;;  %1023 = vmatpush.bf16.msrb.mxu3 %v1442_v1 }
 0xf11   :  { %1531 = vtanh.f32 %v446_v2 }
 0xf17   :  { %v1532_v3 = vpop.eup %1531 }
 0xf18   :  { %449 = vrot.lane.b32.xlu2 %v1532_v3, %s1583_s23  ;;  %v1471_v3 = vld [vmem:[%s1944_s5 + $0x1a8] sm:$0xff] }
 0xf19   :  { %1057 = vmatpush.bf16.msrb.mxu2 %v1471_v3 }
 0xf1a   :  { %v986_v27 = vpop.f32.mrf.mxu0 }
 0xf1d   :  { %1058 = vmatpush.bf16.msrb.mxu2 %v1470_v8 }
 0xf1e   :  { %v1012_v30 = vpop.f32.mrf.mxu2 }
 0xf22   :  { %v988_v32 = vpop.f32.mrf.mxu0 }
 0xf26   :  { %v1014_v37 = vpop.f32.mrf.mxu2 }
 0xf72   :  { %v450_v4 = vpop.permute.xlu2 %449 }
 0xf73   :  { %v452_v5 = vmul.f32 %v450_v4, %v434_v61  ;;  %v1456_v61 = vld [vmem:[%s1944_s5 + $0x130] sm:$0xff]  ;;  %v1455_v4 = vld [vmem:[%s1944_s5 + $0x128] sm:$0xff] }
 0xf74   :  { %1030 = vmatpush.bf16.msra.mxu0 %v1456_v61 }
 0xf75   :  { %464 = vrot.lane.b32.xlu0 %v452_v5, %s1584_s28  ;;  %v511_v5 = vld [vmem:[%s1943_s4] sm:$0xff] }
 0xf78   :  { %1031 = vmatpush.bf16.msra.mxu0 %v1455_v4 }
 0xfe7   :  { %v465_v6 = vpop.permute.xlu0 %464 }
 0xfe8   :  { %1190 = vmatmul.msk.f32.vlgmr.msra.gmra.mxu3 %vm58_vm1, %v465_v6  ;;  %v1463_v6 = vld [vmem:[%s1944_s5 + $0x168] sm:$0xff] }
 0xfe9   :  { %1088 = vmatpush.msra.mxu3 %v511_v5  ;;  %1044 = vmatpush.bf16.msrb.mxu1 %v1463_v6 }
 0xff0   :  { %1024 = vmatmul.bf16.vlgmr.msrb.gmra.mxu3 %v630_v7 }
 0xff1   :  { %1416 = vmatpush.msk.msrb.mxu3 %vm56_vm0, %v1102_v34 }
 0xff3   :  { %1127 = vmatpush.msrb.mxu3 %v1101_v48 }
 0xff5   :  { %1128 = vmatpush.msrb.mxu3 %v1100_v49 }
 0xff7   :  { %1129 = vmatpush.msrb.mxu3 %v1099_v50 }
0x106b   :  { %v485_v10 = vpop.f32.mrf.mxu3 }
0x106c   :  { %v488_v11 = vadd.f32 %v485_v10, %v462_v9  ;;  %v1454_v9 = vld [vmem:[%s1944_s5 + $0x120] sm:$0xff] }
0x106d   :  { %v1462_v10 = vld [vmem:[%s1944_s5 + $0x160] sm:$0xff]  ;;  %1032 = vmatpush.bf16.msra.mxu0 %v1454_v9 }
0x106e   :  { %1533 = vtanh.f32 %v488_v11  ;;  %v489_v13 = vmul.f32 0.5, %v488_v11  ;;  %v1469_v11 = vld [vmem:[%s1944_s5 + $0x198] sm:$0xff]  ;;  %1045 = vmatpush.bf16.msrb.mxu1 %v1462_v10 }
0x106f   :  { %1059 = vmatpush.bf16.msrb.mxu2 %v1469_v11 }
0x1070   :  { %1535 = vtanh.f32 %v489_v13  ;;  %v1461_v13 = vld [vmem:[%s1944_s5 + $0x158] sm:$0xff] }
0x1072   :  { %1046 = vmatpush.bf16.msrb.mxu1 %v1461_v13 }
0x1073   :  { %v1025_v35 = vpop.f32.mrf.mxu3 }
0x1074   :  { %v1534_v12 = vpop.eup %1533 }
0x1075   :  { %496 = vrot.lane.b32.xlu1 %v1534_v12, %s1581_s21  ;;  %v1453_v12 = vld [vmem:[%s1944_s5 + $0x118] sm:$0xff] }
0x1076   :  { %v1536_v14 = vpop.eup %1535  ;;  %1033 = vmatpush.bf16.msra.mxu0 %v1453_v12 }
0x1077   :  { %v491_v15 = vadd.f32 1.0, %v1536_v14  ;;  %v1468_v14 = vld [vmem:[%s1944_s5 + $0x190] sm:$0xff] }
0x1078   :  { %1060 = vmatpush.bf16.msrb.mxu2 %v1468_v14 }
0x1079   :  { %v1734_v16 = vmul.f32 0.5, %v491_v15  ;;  %v1452_v15 = vld [vmem:[%s1944_s5 + $0x110] sm:$0xff] }
0x107a   :  { %1034 = vmatpush.bf16.msra.mxu0 %v1452_v15 }
0x107b   :  { %v494_v19 = vmul.f32 %v1734_v16, %v446_v2  ;;  %v628_v2 = vld [vmem:[#allocation1 + $0x9] sm:$0xff]  ;;  %v1027_v38 = vpop.f32.mrf.mxu3 }
0x107c   :  { %998 = vmatmul.bf16.vlgmr.msra.gmra.mxu1 %v628_v2 }
0x10e7   :  { %v497_v17 = vpop.permute.xlu1 %496 }
0x10e8   :  { %v499_v18 = vmul.f32 %v497_v17, %v1734_v16  ;;  %v1467_v17 = vld [vmem:[%s1944_s5 + $0x188] sm:$0xff] }
0x10e9   :  { %1061 = vmatpush.bf16.msrb.mxu2 %v1467_v17 }
0x10ea   :  { %501 = vrot.lane.b32.xlu2 %v499_v18, %s1582_s22  ;;  %v1451_v18 = vld [vmem:[%s1944_s5 + $0x108] sm:$0xff] }
0x10eb   :  { %1035 = vmatpush.bf16.msra.mxu0 %v1451_v18 }
0x10f9   :  { %v999_v28 = vpop.f32.mrf.mxu1 }
0x10fa   :  { %v1000_v29 = vadd.f32 %v999_v28, %v986_v27 }
0x10fc   :  { %v1013_v31 = vadd.f32 %v1012_v30, %v1000_v29 }
0x10fe   :  { %v1026_v36 = vadd.f32 %v1025_v35, %v1013_v31 }
0x1101   :  { %v1001_v33 = vpop.f32.mrf.mxu1 }
0x1144   :  { %v502_v20 = vpop.permute.xlu2 %501 }
0x1145   :  { %v504_v21 = vadd.f32 %v502_v20, %v494_v19  ;;  %v1459_v19 = vld [vmem:[%s1944_s5 + $0x148] sm:$0xff]  ;;  %v1466_v20 = vld [vmem:[%s1944_s5 + $0x180] sm:$0xff] }
0x1146   :  { %1062 = vmatpush.bf16.msrb.mxu2 %v1466_v20 }
0x1147   :  { %1537 = vtanh.f32 %v504_v21  ;;  %v1450_v21 = vld [vmem:[%s1944_s5 + $0x100] sm:$0xff] }
0x1148   :  { %1036 = vmatpush.bf16.msra.mxu0 %v1450_v21 }
0x1149   :  { %1063 = vmatmul.bf16.vlgmr.msrb.gmra.mxu2 %v633_v23 }
0x114b   :  { %1037 = vmatmul.bf16.vlgmr.msra.gmra.mxu0 %v631_v24 }
0x114d   :  { %v1538_v22 = vpop.eup %1537 }
0x114e   :  { %507 = vrot.lane.b32.xlu0 %v1538_v22, %s1583_s23  ;;  %v1458_v22 = vld [vmem:[%s1944_s5 + $0x140] sm:$0xff] }
0x11c0   :  { %v508_v56 = vpop.permute.xlu0 %507 }
0x11c1   :  { %v510_v59 = vmul.f32 %v508_v56, %v1734_v16  ;;  %v1460_v16 = vld [vmem:[%s1944_s5 + $0x150] sm:$0xff]  ;;  %v1490_v56 = vld [vmem:[%s1947_s8] ss:$0 sm:$0xff] }
0x11c2   :  { %1047 = vmatpush.bf16.msrb.mxu1 %v1460_v16 }
0x11c3   :  { %1069 = vrot.lane.b32.xlu1 %v510_v59, %s1584_s28 }
0x11c6   :  { %1048 = vmatpush.bf16.msrb.mxu1 %v1459_v19 }
0x11c8   :  { %v1038_v39 = vpop.f32.mrf.mxu0 }
0x11c9   :  { %v1039_v40 = vadd.f32 %v1038_v39, %v1026_v36 }
0x11ca   :  { %1049 = vmatpush.bf16.msrb.mxu1 %v1458_v22 }
0x11cc   :  { %v1064_v43 = vpop.f32.mrf.mxu2 }
0x11cd   :  { %1050 = vmatmul.bf16.vlgmr.msrb.gmra.mxu1 %v632_v25 }
0x11d0   :  { %v1040_v45 = vpop.f32.mrf.mxu0 }
0x11d4   :  { %v1066_v47 = vpop.f32.mrf.mxu2 }
0x1235   :  { %v1070_v26 = vpop.permute.xlu1 %1069 }
0x1236   :  { %1415 = vmatmul.msk.f32.vlgmr.msra.gmra.mxu3 %vm58_vm1, %v1070_v26 }
0x124a   :  { %v1051_v41 = vpop.f32.mrf.mxu1 }
0x124b   :  { %v1052_v42 = vadd.f32 %v1051_v41, %v1039_v40 }
0x124d   :  { %v1065_v44 = vadd.f32 %v1064_v43, %v1052_v42 }
0x1252   :  { %v1053_v46 = vpop.f32.mrf.mxu1 }
0x12b9   :  { %v1090_v52 = vpop.f32.mrf.mxu3 }
0x12ba   :  { %v1091_v53 = vadd.f32 %v1090_v52, %v1065_v44 }
0x12bc   :  { %v1097_v54 = vadd.f32 %v1489_v51, %v1091_v53 }
0x12be   :  { %v1098_v55 = vmax.f32 %v1097_v54, 0.0 }
0x12c0   :  { %1417 = vmatmul.msk.f32.vlgmr.msrb.gmra.mxu3 %vm1107_vm2, %v1098_v55 }
0x1343   :  { %v1131_v57 = vpop.f32.mrf.mxu3 }
0x1344   :  { %v1132_v58 = vadd.f32 %v1490_v56, %v1131_v57 }
0x1346   :  { %1135 = vst.msk [vmem:[#allocation5] sm:$0x3] %vm1134_vm3, %v1132_v58 }
0x1347   :  { %1146 = dma.vmem_to_hbm [thread:$0]  %s1142_s26, 32, %s1144_s7, [#allocation3]  }
0x1348   :  { %1577 = dma.done.wait [#allocation3], 32  }
0x1349   :  { %1578 = vsyncadd [#allocation3], 4294967264 }
0x134a   :  { %1151 = vsyncpa [#allocation3], 1 }
0x134b   :  { %1152 = vsyncpa [#allocation4], 1 }

</bundles_post_ra>
